<compile_context>
chip_gen: v6e
topology: v6e:2x2x1
jax: 0.10.0
libtpu: 0.0.40
codegen_flags: <defaults>
</compile_context>

<pallas_src>
import math

import jax
import jax.numpy as jnp
from jax.experimental import pallas as pl
from jax.experimental.pallas import tpu as pltpu

_MiB = 1024 * 1024


def _round_up(x, m):
    return (x + m - 1) // m * m


def _cdiv(a, b):
    return -(-a // b)


def _selfloop_bias_kernel(x_ref, w_ref, b_ref, o_ref):
    # x_ref: (tm, F_in), w_ref: (F_in, F_out) resident, b_ref: (1, F_out)
    acc = jnp.dot(x_ref[...], w_ref[...], preferred_element_type=jnp.float32)
    o_ref[...] = (acc + b_ref[...]).astype(o_ref.dtype)


def _selfloop_nobias_kernel(x_ref, w_ref, o_ref):
    acc = jnp.dot(x_ref[...], w_ref[...], preferred_element_type=jnp.float32)
    o_ref[...] = acc.astype(o_ref.dtype)


def _invariant_spec(shape):
    """BlockSpec for a grid-invariant operand; single-buffered when supported."""
    index_map = lambda i: tuple(0 for _ in shape)
    try:
        return pl.BlockSpec(shape, index_map, pipeline_mode=pl.Buffered(1))
    except (TypeError, AttributeError):
        # Older jax without pipeline_mode / Buffered: fall back to default.
        return pl.BlockSpec(shape, index_map)


def _vmem_budget_bytes():
    """(usable scratch budget, vmem_limit_bytes) per TPU generation."""
    cap = 64 * _MiB  # conservative default (v7x-class: 64 MiB per TC)
    try:
        cap = int(pltpu.get_tpu_info().vmem_capacity_bytes)
    except Exception:
        pass
    if cap <= 64 * _MiB:
        return 40 * _MiB, 48 * _MiB        # v7x: leave headroom under 64 MiB
    return 100 * _MiB, 100 * _MiB          # v5e / v6e: 128 MiB physical


def selfloop_forward(x, weight, bias=None, *, tm=2048, use_bf16_inputs=False):
    """output = x @ weight (+ bias).

    x: [N, F_in], weight: [F_in, F_out], bias: [F_out] or None -> [N, F_out]
    """
    n, f_in = x.shape
    f_out = weight.shape[1]
    out_dtype = x.dtype

    if use_bf16_inputs:
        # bf16 MXU operands, f32 accumulation.  Only worthwhile if the casts
        # fuse with the producer; default off so the f32 reference stays tight.
        x = x.astype(jnp.bfloat16)
        weight = weight.astype(jnp.bfloat16)
    row_align = 16 if use_bf16_inputs else 8

    budget, vmem_limit = _vmem_budget_bytes()

    x_isz = jnp.dtype(x.dtype).itemsize
    w_isz = jnp.dtype(weight.dtype).itemsize
    o_isz = jnp.dtype(out_dtype).itemsize
    weight_bytes = f_in * f_out * w_isz
    bias_bytes = 0 if bias is None else f_out * jnp.dtype(bias.dtype).itemsize
    # Double-buffered x and output row tiles; weight / bias resident (1 buffer).
    per_row_bytes = 2 * (f_in * x_isz + f_out * o_isz)

    avail = budget - weight_bytes - bias_bytes
    if avail < row_align * per_row_bytes:
        # TODO(synk): weight too large to stay resident within the per-gen VMEM
        # budget -- add a K-axis grid with a VMEM f32 accumulator.  Fall through
        # with the minimum row tile for now.
        tm_budget = row_align
    else:
        tm_budget = (avail // per_row_bytes) // row_align * row_align
    tm_cap = max(row_align, min(int(tm), int(tm_budget)))

    # Balance tiles; give multi-TC chips (v7x) at least 2 parallel steps when
    # N is moderate (costs one extra ~0.35us grid step on 1-TC chips).
    num_steps = _cdiv(n, tm_cap)
    if num_steps == 1 and n >= 256:
        num_steps = 2
    if num_steps == 1:
        tm_eff = n                       # single full-array block (any N legal)
    else:
        tm_eff = _round_up(_cdiv(n, num_steps), row_align)
    grid = _cdiv(n, tm_eff)              # last block masked by Pallas if ragged

    x_spec = pl.BlockSpec((tm_eff, f_in), lambda i: (i, 0))
    w_spec = _invariant_spec((f_in, f_out))
    out_spec = pl.BlockSpec((tm_eff, f_out), lambda i: (i, 0))

    cost = pl.CostEstimate(
        flops=2 * n * f_in * f_out,
        transcendentals=0,
        bytes_accessed=n * f_in * x_isz + n * f_out * o_isz
        + weight_bytes + bias_bytes,
    )
    compiler_params = pltpu.CompilerParams(
        dimension_semantics=("parallel",),
        vmem_limit_bytes=vmem_limit,
    )

    if bias is None:
        kernel = _selfloop_nobias_kernel
        in_specs = [x_spec, w_spec]
        args = (x, weight)
    else:
        bias2d = bias.reshape(1, f_out)
        kernel = _selfloop_bias_kernel
        in_specs = [x_spec, w_spec, _invariant_spec((1, f_out))]
        args = (x, weight, bias2d)

    return pl.pallas_call(
        kernel,
        out_shape=jax.ShapeDtypeStruct((n, f_out), out_dtype),
        grid_spec=pltpu.PrefetchScalarGridSpec(
            num_scalar_prefetch=0,
            grid=(grid,),
            in_specs=in_specs,
            out_specs=out_spec,
        ),
        compiler_params=compiler_params,
        cost_estimate=cost,
    )(*args)


if __name__ == "__main__":
    # Module config: in_features -> out_features, small node count.
    num_nodes, in_features, out_features = 16, 32, 8

    key = jax.random.PRNGKey(0)
    kx, kw, kb = jax.random.split(key, 3)

    # Deterministic init mirroring reset_parameters(): uniform(-stdv, stdv),
    # stdv = 1/sqrt(out_features).
    stdv = 1.0 / math.sqrt(out_features)
    weight = jax.random.uniform(
        kw, (in_features, out_features), dtype=jnp.float32, minval=-stdv, maxval=stdv
    )
    bias = jax.random.uniform(
        kb, (out_features,), dtype=jnp.float32, minval=-stdv, maxval=stdv
    )
    x = jax.random.normal(kx, (num_nodes, in_features), dtype=jnp.float32)

    # Tiny case: collapses to a single full-array block.
    out = jax.block_until_ready(selfloop_forward(x, weight, bias))
    ref = x @ weight + bias
    assert out.shape == (num_nodes, out_features)
    assert jnp.allclose(out, ref, atol=1e-5, rtol=1e-5)

    # Moderate, non-divisible N: exercises the balanced multi-step grid and the
    # masked ragged last tile (no wrapper-side pad / slice).
    n2 = 1000
    x2 = jax.random.normal(jax.random.PRNGKey(1), (n2, in_features), dtype=jnp.float32)
    out2 = jax.block_until_ready(selfloop_forward(x2, weight, bias))
    ref2 = x2 @ weight + bias
    assert out2.shape == (n2, out_features)
    assert jnp.allclose(out2, ref2, atol=1e-5, rtol=1e-5)

    # bias=None variant (separate kernel, no zero-bias DMA / add).
    out3 = jax.block_until_ready(selfloop_forward(x2, weight, None))
    assert jnp.allclose(out3, x2 @ weight, atol=1e-5, rtol=1e-5)

    print("KERNEL_OK")
</pallas_src>

<mosaic_0001>
module attributes {stable_mosaic.version = 11 : i64} {
  func.func @_selfloop_bias_kernel(%arg0: i32, %arg1: memref<16x32xf32, #tpu.memory_space<vmem>>, %arg2: memref<32x8xf32, #tpu.memory_space<vmem>>, %arg3: memref<1x8xf32, #tpu.memory_space<vmem>>, %arg4: memref<16x8xf32, #tpu.memory_space<vmem>>) attributes {dimension_semantics = [#tpu.dimension_semantics<parallel>], iteration_bounds = array<i64: 1>, scalar_prefetch = 0 : i64, scratch_operands = 0 : i64, tpu.core_type = #tpu.core_type<tc>, window_params = [{transform_indices = @transform_0, window_bounds = array<i64: 16, 32>}, {pipeline_mode = #tpu.pipeline_mode<synchronous>, transform_indices = @transform_1, window_bounds = array<i64: 32, 8>}, {pipeline_mode = #tpu.pipeline_mode<synchronous>, transform_indices = @transform_2, window_bounds = array<i64: 1, 8>}, {transform_indices = @transform_3, window_bounds = array<i64: 16, 8>}]} {
    %c0 = arith.constant 0 : index
    %c0_0 = arith.constant 0 : index
    %0 = vector.load %arg1[%c0, %c0_0] : memref<16x32xf32, #tpu.memory_space<vmem>>, vector<16x32xf32>
    %c0_1 = arith.constant 0 : index
    %c0_2 = arith.constant 0 : index
    %1 = vector.load %arg2[%c0_1, %c0_2] : memref<32x8xf32, #tpu.memory_space<vmem>>, vector<32x8xf32>
    %cst = arith.constant dense<0.000000e+00> : vector<16x8xf32>
    %2 = tpu.matmul %0, %1, %cst {dimension_numbers = #tpu.dot_dimension_numbers<[1], [0], [0], [1], [0, 0, 1, 1], [], []>} : vector<16x32xf32>, vector<32x8xf32>, vector<16x8xf32> -> vector<16x8xf32>
    %c0_3 = arith.constant 0 : index
    %c0_4 = arith.constant 0 : index
    %3 = vector.load %arg3[%c0_3, %c0_4] : memref<1x8xf32, #tpu.memory_space<vmem>>, vector<1x8xf32>
    %4 = vector.broadcast %3 : vector<1x8xf32> to vector<16x8xf32>
    %5 = arith.addf %2, %4 : vector<16x8xf32>
    %c0_5 = arith.constant 0 : index
    %c0_6 = arith.constant 0 : index
    %6 = vector.load %arg4[%c0_5, %c0_6] : memref<16x8xf32, #tpu.memory_space<vmem>>, vector<16x8xf32>
    tpu.vector_store %arg4[%c0_5, %c0_6], %5 {strides = array<i32>} : memref<16x8xf32, #tpu.memory_space<vmem>>, vector<16x8xf32>,
    return
  }
  func.func @transform_0(%arg0: i32) -> (i32, i32) {
    %c0_i32 = arith.constant 0 : i32
    %c0_i32_0 = arith.constant 0 : i32
    return %arg0, %c0_i32 : i32, i32
  }
  func.func @transform_1(%arg0: i32) -> (i32, i32) {
    %c0_i32 = arith.constant 0 : i32
    %c0_i32_0 = arith.constant 0 : i32
    %c0_i32_1 = arith.constant 0 : i32
    return %c0_i32, %c0_i32_0 : i32, i32
  }
  func.func @transform_2(%arg0: i32) -> (i32, i32) {
    %c0_i32 = arith.constant 0 : i32
    %c0_i32_0 = arith.constant 0 : i32
    %c0_i32_1 = arith.constant 0 : i32
    return %c0_i32, %c0_i32_0 : i32, i32
  }
  func.func @transform_3(%arg0: i32) -> (i32, i32) {
    %c0_i32 = arith.constant 0 : i32
    %c0_i32_0 = arith.constant 0 : i32
    return %arg0, %c0_i32 : i32, i32
  }
}

</mosaic_0001>

<bundles_post_ra>
// kernel: tpu_custom_call.1
= control target key start
LH: loop header
LB: loop body
LE: loop exit
PB: predicated region body
PF: predicated region fallthrough
CT: control target
= control target key end

     0   :  { %vm27_vm0 = vcmask 261120   ;;  %vm109_vm1 = vcmask 64512   ;;  %s185_s1 = inlined_call_operand.vmem [shape: f32[32,8], index: 1, kind: input, shape index: {}]   ;;  %s186_s0 = inlined_call_operand.vmem [shape: f32[16,32], index: 0, kind: input, shape index: {}]   ;;  %s187_s2 = inlined_call_operand.vmem [shape: f32[1,8], index: 2, kind: input, shape index: {}]   ;;  %s188_s3 = inlined_call_operand.vmem [shape: f32[16,8], index: 3, kind: output, shape index: {}]  }
   0x1   :  { %v19_v0 = vld [vmem:[%s185_s1 + $0x18] sm:$0xff]  ;;  %v18_v1 = vld [vmem:[%s185_s1 + $0x10] sm:$0xff]  ;;  %v14_v2 = vld [vmem:[%s186_s0] sm:$0xff] }
   0x2   :  { %125 = vmatprep.subr.mxu0 %v19_v0  ;;  %v17_v3 = vld [vmem:[%s185_s1 + $0x8] sm:$0xff]  ;;  %133 = vmatprep.mubr.msk.f32.mxu0 %vm27_vm0, %v14_v2  ;;  %v16_v4 = vld [vmem:[%s185_s1] sm:$0xff] }
   0x3   :  { %126 = vmatpush3.msra.mxu0 %v19_v0  ;;  %v15_v5 = vld [vmem:[%s186_s0 + $0x8] sm:$0xff]  ;;  %v116_v6 = vld [vmem:[%s187_s2] ss:$0 sm:$0xff] }
   0x4   :  { %127 = vmatprep.subr.mxu0 %v18_v1 }
   0x5   :  { %128 = vmatpush3.msra.mxu0 %v18_v1 }
   0x6   :  { %129 = vmatprep.subr.mxu0 %v17_v3 }
   0x7   :  { %130 = vmatpush3.msra.mxu0 %v17_v3 }
   0x8   :  { %131 = vmatprep.subr.mxu0 %v16_v4 }
   0x9   :  { %132 = vmatpush3.msra.mxu0 %v16_v4 }
   0xa   :  { %134 = vmatmul.mubr.msk.f32.vlgmr.msra.gmra.mxu0 %vm27_vm0, %v15_v5 }
  0xca   :  { %v135_v7 = vpop.f32.mrf.mxu0 }
  0xcb   :  { %v106_v8 = vadd.f32 %v135_v7, %v116_v6 }
  0xcc   :  { %v100_v9 = vpop.f32.mrf.mxu0 }
  0xcd   :  { %111 = vst.msk [vmem:[%s188_s3 + $0x8] sm:$0xff] %vm109_vm1, %v106_v8  ;;  %v101_v10 = vadd.f32 %v116_v6, %v100_v9 }
  0xcf   :  { %110 = vst.msk [vmem:[%s188_s3] sm:$0xff] %vm109_vm1, %v101_v10 }

</bundles_post_ra>
